<compile_context>
chip_gen: v5e
topology: v5e:2x2
jax: 0.10.0
libtpu: 0.0.40
codegen_flags: <defaults>
</compile_context>

<pallas_src>
import functools

import jax
import jax.numpy as jnp
import numpy as np
from jax.experimental import pallas as pl
from jax.experimental.pallas import tpu as pltpu

MASK_BIAS = -1e30  # additive mask for non-edges; exp underflows to exactly 0


def _round_up(x, m):
    return ((x + m - 1) // m) * m


def _choose_tile_rows(n):
    """Largest row tile in {512,...,8} that still gives >= 2 grid steps."""
    for t in (512, 256, 128, 64, 32, 16, 8):
        if n >= 2 * t:
            return t
    return 8


# ---------------------------------------------------------------------------
# Kernels
# ---------------------------------------------------------------------------
def _attend_head(bias_f32, s_dst_col, s_src_row, xw_aug_b16, fout):
    """Masked-softmax attention + aggregation for one head on one row tile.

    bias_f32:   (TILE_R, N) additive mask (0 on edges/self loops, -1e30 else)
    s_dst_col:  (TILE_R, 1) f32  alpha_dst for the tile's query rows
    s_src_row:  (1, N)      f32  alpha_src for all key nodes
    xw_aug_b16: (N, fout+1) bf16 per-head key features + trailing ones column,
                so a single MXU pass yields [numerator | denominator].
    """
    e = s_dst_col + s_src_row                              # (TILE_R, N)
    e = jnp.where(e > 0.0, e, 0.2 * e) + bias_f32          # LeakyReLU(0.2)+mask
    # Self loops guarantee the row max is attained at an unmasked entry, so
    # the denominator is >= 1 and the approx reciprocal below is safe.
    p = jnp.exp(e - jnp.max(e, axis=-1, keepdims=True))    # (TILE_R, N)
    nd = jnp.dot(p.astype(jnp.bfloat16), xw_aug_b16,
                 preferred_element_type=jnp.float32)       # (TILE_R, fout+1)
    return nd[:, :fout] * pl.reciprocal(nd[:, fout:fout + 1], approx=True)


def _gat_concat_kernel(bias_ref, sdst_ref, ssrc_ref, xwaug_ref, b_ref, o_ref,
                       *, heads, fout, lanes_out):
    """conv1: GATConv(heads=h0, concat=True) attention + bias + ELU."""
    bias = bias_ref[...].astype(jnp.float32)               # cast once per tile
    sdst = sdst_ref[...]                                   # (TILE_R, heads)
    cols = []
    for g in range(heads):                                 # static unroll
        cols.append(_attend_head(bias, sdst[:, g:g + 1],
                                 ssrc_ref[g:g + 1, :], xwaug_ref[g], fout))
    h = jnp.concatenate(cols, axis=-1) + b_ref[...]        # (TILE_R, heads*fout)
    h = jnp.where(h > 0.0, h, jnp.exp(h) - 1.0)            # ELU(alpha=1)
    pad = lanes_out - heads * fout
    if pad:
        h = jnp.concatenate([h, jnp.zeros((h.shape[0], pad), h.dtype)], axis=-1)
    o_ref[...] = h                                         # one lane-dense store


def _gat_mu_logstd_kernel(bias_ref, sdst_ref, ssrc_ref, xwaug_ref,
                          bmu_ref, bls_ref, o_ref, *, h1, fout, lanes_out):
    """conv_mu + conv_logstd fused: GATConv(heads=h1, concat=False) twice,
    sharing the bias strip / exp machinery. Heads [0, h1) are mu, [h1, 2*h1)
    are logstd."""
    bias = bias_ref[...].astype(jnp.float32)
    sdst = sdst_ref[...]                                   # (TILE_R, 2*h1)
    branch = []
    for b in range(2):                                     # 0: mu, 1: logstd
        acc = None
        for k in range(h1):
            g = b * h1 + k
            r = _attend_head(bias, sdst[:, g:g + 1],
                             ssrc_ref[g:g + 1, :], xwaug_ref[g], fout)
            acc = r if acc is None else acc + r
        branch.append(acc * (1.0 / h1))                    # mean over heads
    res = jnp.concatenate([branch[0] + bmu_ref[...],
                           branch[1] + bls_ref[...]], axis=-1)
    pad = lanes_out - 2 * fout
    if pad:
        res = jnp.concatenate(
            [res, jnp.zeros((res.shape[0], pad), res.dtype)], axis=-1)
    o_ref[...] = res                                       # one lane-dense store


# ---------------------------------------------------------------------------
# Wrapper-side helpers
# ---------------------------------------------------------------------------
def _attention_inputs(xw, a_src, a_dst):
    """Per-head attention operands for the row-tiled kernels.

    Returns:
      s_dst:   (N, heads)         f32  (streamed with the query rows)
      s_src_t: (heads, N)         f32  (resident; transposed once per layer)
      xw_aug:  (heads, N, fout+1) bf16 (resident; [xW_h | 1] per head)
    """
    n = xw.shape[0]
    heads, fout = a_src.shape
    xwh = xw.reshape(n, heads, fout)
    s_dst = jnp.einsum("nhf,hf->nh", xwh, a_dst)
    s_src_t = jnp.einsum("nhf,hf->hn", xwh, a_src)
    xw_aug = jnp.concatenate([xwh, jnp.ones((n, heads, 1), xw.dtype)], axis=-1)
    xw_aug = jnp.transpose(xw_aug, (1, 0, 2)).astype(jnp.bfloat16)
    return s_dst, s_src_t, xw_aug


def _vmem_limit_bytes(tile_r, n_pad, heads, faug, lanes_out):
    """Explicit scoped-VMEM request: double-buffered strips + residents +
    per-head (TILE_R, N) f32 temporaries, with headroom."""
    need = (2 * tile_r * n_pad * 2                       # bias strips (bf16)
            + 2 * tile_r * max(heads, 8) * 4             # dst-score strips
            + 2 * max(heads, 8) * n_pad * 4              # resident src scores
            + 2 * heads * n_pad * max(faug, 128) * 2     # resident [xW | 1]
            + 2 * tile_r * lanes_out * 4                 # output strips
            + 6 * tile_r * max(n_pad, 128) * 4)          # e / p temporaries
    return min(max(need + (2 << 20), 16 << 20), 64 << 20)


def _run_gat_layer(kernel, mask_bias, s_dst, s_src_t, xw_aug, layer_biases,
                   lanes_out, tile_r):
    n_pad = mask_bias.shape[0]
    heads, _, faug = xw_aug.shape
    inputs = (mask_bias, s_dst, s_src_t, xw_aug) + tuple(layer_biases)
    in_specs = [
        pl.BlockSpec((tile_r, n_pad), lambda i: (i, 0)),          # mask strip (streamed)
        pl.BlockSpec((tile_r, heads), lambda i: (i, 0)),          # dst scores (streamed)
        pl.BlockSpec((heads, n_pad), lambda i: (0, 0)),           # src scores (resident)
        pl.BlockSpec((heads, n_pad, faug), lambda i: (0, 0, 0)),  # [xW | 1]   (resident)
    ] + [pl.BlockSpec(b.shape, lambda i: (0, 0)) for b in layer_biases]
    return pl.pallas_call(
        kernel,
        out_shape=jax.ShapeDtypeStruct((n_pad, lanes_out), jnp.float32),
        grid=(n_pad // tile_r,),
        in_specs=in_specs,
        out_specs=pl.BlockSpec((tile_r, lanes_out), lambda i: (i, 0)),
        compiler_params=pltpu.CompilerParams(
            # Independent row tiles -> shard across v7x's two TensorCores.
            dimension_semantics=("parallel",),
            vmem_limit_bytes=_vmem_limit_bytes(tile_r, n_pad, heads, faug,
                                               lanes_out)),
    )(*inputs)


def gat_vgae_encoder(params, x, edge_index, hid_channels, out_channels,
                     heads=(4, 2), tile_rows=None):
    """forward(x, edge_index) -> (mu, logstd), eval mode."""
    h0, h1 = heads
    n = x.shape[0]
    if tile_rows is None:
        tile_rows = _choose_tile_rows(n)
    n_pad = _round_up(n, tile_rows)
    mask_bias = edge_index_to_bias(edge_index, n, padded_nodes=n_pad)  # bf16
    x_p = jnp.pad(x, ((0, n_pad - n), (0, 0)))

    # conv1 projection + attention operands (dense O(N*width) matmuls kept in
    # XLA; the row-tiled kernel then needs no cross-tile init and stays
    # megacore-parallel-safe).
    xw1 = x_p @ params["w1"]                                 # (n_pad, h0*hid)
    sd1, ss1, xa1 = _attention_inputs(xw1, params["a_src1"], params["a_dst1"])
    lanes_h = _round_up(h0 * hid_channels, 128)
    k1 = functools.partial(_gat_concat_kernel, heads=h0, fout=hid_channels,
                           lanes_out=lanes_h)
    h = _run_gat_layer(k1, mask_bias, sd1, ss1, xa1, (params["b1"],),
                       lanes_h, tile_rows)[:, :h0 * hid_channels]

    # conv_mu / conv_logstd fused: one projection, one attention kernel pass.
    w2 = jnp.concatenate([params["w_mu"], params["w_ls"]], axis=1)
    a_src2 = jnp.concatenate([params["a_src_mu"], params["a_src_ls"]], axis=0)
    a_dst2 = jnp.concatenate([params["a_dst_mu"], params["a_dst_ls"]], axis=0)
    xw2 = h @ w2                                             # (n_pad, 2*h1*out)
    sd2, ss2, xa2 = _attention_inputs(xw2, a_src2, a_dst2)
    lanes_o = _round_up(2 * out_channels, 128)
    k2 = functools.partial(_gat_mu_logstd_kernel, h1=h1, fout=out_channels,
                           lanes_out=lanes_o)
    out = _run_gat_layer(k2, mask_bias, sd2, ss2, xa2,
                         (params["b_mu"], params["b_ls"]), lanes_o, tile_rows)
    return out[:n, :out_channels], out[:n, out_channels:2 * out_channels]


# ---------------------------------------------------------------------------
# Graph utilities, parameter init, dense f32 reference
# ---------------------------------------------------------------------------
def edge_index_to_adj(edge_index, num_nodes):
    """Dense 0/1 adjacency: adj[i, j] = 1 iff edge j -> i exists or i == j
    (self loops, matching PyG GATConv's remove+add_self_loops)."""
    src, dst = edge_index[0], edge_index[1]
    adj = jnp.zeros((num_nodes, num_nodes), jnp.float32)
    adj = adj.at[dst, src].set(1.0)
    idx = jnp.arange(num_nodes)
    return adj.at[idx, idx].set(1.0)


def edge_index_to_bias(edge_index, num_nodes, padded_nodes=None):
    """bf16 additive attention mask at (optionally padded) size: 0.0 on edges
    and self loops, -1e30 elsewhere. Padded rows keep a self loop so their
    softmax stays well defined; padded columns are masked for real rows."""
    n_pad = num_nodes if padded_nodes is None else padded_nodes
    adj = edge_index_to_adj(edge_index, n_pad)
    return jnp.where(adj > 0.0, 0.0, MASK_BIAS).astype(jnp.bfloat16)


def _glorot(key, shape):
    fan_in, fan_out = shape[-2], shape[-1]
    limit = (6.0 / (fan_in + fan_out)) ** 0.5
    return jax.random.uniform(key, shape, jnp.float32, -limit, limit)


def init_params(key, in_channels, hid_channels, out_channels, heads=(4, 2)):
    ks = jax.random.split(key, 12)
    h0, h1 = heads
    return {
        # conv1: GATConv(in, hid, heads=h0, concat=True)
        "w1": _glorot(ks[0], (in_channels, h0 * hid_channels)),
        "a_src1": _glorot(ks[1], (h0, hid_channels)),
        "a_dst1": _glorot(ks[2], (h0, hid_channels)),
        "b1": 0.1 * jax.random.normal(ks[3], (1, h0 * hid_channels), jnp.float32),
        # conv_mu: GATConv(hid*h0, out, heads=h1, concat=False)
        "w_mu": _glorot(ks[4], (h0 * hid_channels, h1 * out_channels)),
        "a_src_mu": _glorot(ks[5], (h1, out_channels)),
        "a_dst_mu": _glorot(ks[6], (h1, out_channels)),
        "b_mu": 0.1 * jax.random.normal(ks[7], (1, out_channels), jnp.float32),
        # conv_logstd: GATConv(hid*h0, out, heads=h1, concat=False)
        "w_ls": _glorot(ks[8], (h0 * hid_channels, h1 * out_channels)),
        "a_src_ls": _glorot(ks[9], (h1, out_channels)),
        "a_dst_ls": _glorot(ks[10], (h1, out_channels)),
        "b_ls": 0.1 * jax.random.normal(ks[11], (1, out_channels), jnp.float32),
    }


def _gat_conv_ref(x, adj, w, a_src, a_dst, b, concat):
    """Dense f32 reference of a single PyG-style GATConv (eval mode)."""
    n = x.shape[0]
    heads, fout = a_src.shape
    xw = (x @ w).reshape(n, heads, fout)
    s_src = jnp.einsum("nhf,hf->nh", xw, a_src)
    s_dst = jnp.einsum("nhf,hf->nh", xw, a_dst)
    e = s_dst[:, None, :] + s_src[None, :, :]              # (dst i, src j, head)
    e = jnp.where(e > 0.0, e, 0.2 * e)
    e = jnp.where(adj[:, :, None] > 0.0, e, -jnp.inf)
    p = jax.nn.softmax(e, axis=1)
    out = jnp.einsum("ijh,jhf->ihf", p, xw)
    out = out.reshape(n, heads * fout) if concat else out.mean(axis=1)
    return out + b


def gat_vgae_reference(params, x, adj):
    h = jax.nn.elu(_gat_conv_ref(x, adj, params["w1"], params["a_src1"],
                                 params["a_dst1"], params["b1"], True))
    mu = _gat_conv_ref(h, adj, params["w_mu"], params["a_src_mu"],
                       params["a_dst_mu"], params["b_mu"], False)
    ls = _gat_conv_ref(h, adj, params["w_ls"], params["a_src_ls"],
                       params["a_dst_ls"], params["b_ls"], False)
    return mu, ls


if __name__ == "__main__":
    key = jax.random.PRNGKey(0)
    k_feat, k_src, k_dst, k_par = jax.random.split(key, 4)

    # Small graph: 16 nodes, 8 input features, hid=8, out=4, heads=(4, 2).
    N, IN_C, HID_C, OUT_C = 16, 8, 8, 4
    HEADS = (4, 2)
    E = 40

    x = jax.random.normal(k_feat, (N, IN_C), jnp.float32)
    edge_index = jnp.stack([
        jax.random.randint(k_src, (E,), 0, N),
        jax.random.randint(k_dst, (E,), 0, N),
    ], axis=0)
    params = init_params(k_par, IN_C, HID_C, OUT_C, HEADS)

    mu, logstd = gat_vgae_encoder(params, x, edge_index, HID_C, OUT_C, HEADS)
    jax.block_until_ready((mu, logstd))

    assert mu.shape == (N, OUT_C) and logstd.shape == (N, OUT_C)
    assert bool(jnp.all(jnp.isfinite(mu))) and bool(jnp.all(jnp.isfinite(logstd)))

    # Loose-tolerance check against a dense f32 reference (attention weights
    # and key features go through bf16 on the MXU inside the kernel).
    mu_ref, ls_ref = gat_vgae_reference(params, x, edge_index_to_adj(edge_index, N))
    np.testing.assert_allclose(np.asarray(mu), np.asarray(mu_ref),
                               rtol=5e-2, atol=5e-2)
    np.testing.assert_allclose(np.asarray(logstd), np.asarray(ls_ref),
                               rtol=5e-2, atol=5e-2)
    print("KERNEL_OK")
</pallas_src>

<mosaic_0001>
module attributes {stable_mosaic.version = 11 : i64} {
  func.func @_gat_concat_kernel(%arg0: i32, %arg1: memref<8x16xbf16, #tpu.memory_space<vmem>>, %arg2: memref<8x4xf32, #tpu.memory_space<vmem>>, %arg3: memref<4x16xf32, #tpu.memory_space<vmem>>, %arg4: memref<4x16x9xbf16, #tpu.memory_space<vmem>>, %arg5: memref<1x32xf32, #tpu.memory_space<vmem>>, %arg6: memref<8x128xf32, #tpu.memory_space<vmem>>) attributes {dimension_semantics = [#tpu.dimension_semantics<parallel>], iteration_bounds = array<i64: 2>, scalar_prefetch = 0 : i64, scratch_operands = 0 : i64, tpu.core_type = #tpu.core_type<tc>, window_params = [{transform_indices = @transform_0, window_bounds = array<i64: 8, 16>}, {transform_indices = @transform_1, window_bounds = array<i64: 8, 4>}, {pipeline_mode = #tpu.pipeline_mode<synchronous>, transform_indices = @transform_2, window_bounds = array<i64: 4, 16>}, {pipeline_mode = #tpu.pipeline_mode<synchronous>, transform_indices = @transform_3, window_bounds = array<i64: 4, 16, 9>}, {pipeline_mode = #tpu.pipeline_mode<synchronous>, transform_indices = @transform_4, window_bounds = array<i64: 1, 32>}, {transform_indices = @transform_5, window_bounds = array<i64: 8, 128>}]} {
    %c0 = arith.constant 0 : index
    %c0_0 = arith.constant 0 : index
    %0 = vector.load %arg1[%c0, %c0_0] : memref<8x16xbf16, #tpu.memory_space<vmem>>, vector<8x16xbf16>
    %1 = arith.extf %0 : vector<8x16xbf16> to vector<8x16xf32>
    %c0_1 = arith.constant 0 : index
    %c0_2 = arith.constant 0 : index
    %2 = vector.load %arg2[%c0_1, %c0_2] : memref<8x4xf32, #tpu.memory_space<vmem>>, vector<8x4xf32>
    %3 = vector.extract_strided_slice %2 {offsets = [0, 0], sizes = [8, 1], strides = [1, 1]} : vector<8x4xf32> to vector<8x1xf32>
    %c0_3 = arith.constant 0 : index
    %c0_4 = arith.constant 0 : index
    %4 = vector.load %arg3[%c0_3, %c0_4] : memref<4x16xf32, #tpu.memory_space<vmem>>, vector<1x16xf32>
    %c0_5 = arith.constant 0 : index
    %c0_6 = arith.constant 0 : index
    %c0_7 = arith.constant 0 : index
    %5 = vector.load %arg4[%c0_5, %c0_6, %c0_7] : memref<4x16x9xbf16, #tpu.memory_space<vmem>>, vector<1x16x9xbf16>
    %6 = vector.shape_cast %5 : vector<1x16x9xbf16> to vector<16x9xbf16>
    %7 = vector.broadcast %3 : vector<8x1xf32> to vector<8x16xf32>
    %8 = vector.broadcast %4 : vector<1x16xf32> to vector<8x16xf32>
    %9 = arith.addf %7, %8 : vector<8x16xf32>
    %cst = arith.constant 0.000000e+00 : f32
    %10 = vector.broadcast %cst : f32 to vector<8x16xf32>
    %11 = arith.cmpf ogt, %9, %10 : vector<8x16xf32>
    %cst_8 = arith.constant 2.000000e-01 : f32
    %12 = vector.broadcast %cst_8 : f32 to vector<8x16xf32>
    %13 = arith.mulf %12, %9 : vector<8x16xf32>
    %14 = arith.select %11, %9, %13 : vector<8x16xi1>, vector<8x16xf32>
    %15 = arith.addf %14, %1 : vector<8x16xf32>
    %cst_9 = arith.constant dense<0xFF800000> : vector<8xf32>
    %16 = vector.multi_reduction <maximumf>, %15, %cst_9 [1] : vector<8x16xf32> to vector<8xf32>
    %17 = vector.shape_cast %16 : vector<8xf32> to vector<8x1xf32>
    %18 = vector.broadcast %17 : vector<8x1xf32> to vector<8x16xf32>
    %19 = arith.subf %15, %18 : vector<8x16xf32>
    %20 = math.exp %19 : vector<8x16xf32>
    %21 = arith.truncf %20 : vector<8x16xf32> to vector<8x16xbf16>
    %cst_10 = arith.constant dense<0.000000e+00> : vector<8x9xf32>
    %22 = tpu.matmul %21, %6, %cst_10 {dimension_numbers = #tpu.dot_dimension_numbers<[1], [0], [0], [1], [0, 0, 1, 1], [], []>} : vector<8x16xbf16>, vector<16x9xbf16>, vector<8x9xf32> -> vector<8x9xf32>
    %23 = vector.extract_strided_slice %22 {offsets = [0, 0], sizes = [8, 8], strides = [1, 1]} : vector<8x9xf32> to vector<8x8xf32>
    %24 = vector.extract_strided_slice %22 {offsets = [0, 8], sizes = [8, 1], strides = [1, 1]} : vector<8x9xf32> to vector<8x1xf32>
    %25 = tpu.reciprocal %24 {approx = true} : vector<8x1xf32> -> vector<8x1xf32>
    %26 = vector.broadcast %25 : vector<8x1xf32> to vector<8x8xf32>
    %27 = arith.mulf %23, %26 : vector<8x8xf32>
    %28 = vector.extract_strided_slice %2 {offsets = [0, 1], sizes = [8, 1], strides = [1, 1]} : vector<8x4xf32> to vector<8x1xf32>
    %c1 = arith.constant 1 : index
    %c0_11 = arith.constant 0 : index
    %29 = vector.load %arg3[%c1, %c0_11] : memref<4x16xf32, #tpu.memory_space<vmem>>, vector<1x16xf32>
    %c1_12 = arith.constant 1 : index
    %c0_13 = arith.constant 0 : index
    %c0_14 = arith.constant 0 : index
    %30 = vector.load %arg4[%c1_12, %c0_13, %c0_14] : memref<4x16x9xbf16, #tpu.memory_space<vmem>>, vector<1x16x9xbf16>
    %31 = vector.shape_cast %30 : vector<1x16x9xbf16> to vector<16x9xbf16>
    %32 = vector.broadcast %28 : vector<8x1xf32> to vector<8x16xf32>
    %33 = vector.broadcast %29 : vector<1x16xf32> to vector<8x16xf32>
    %34 = arith.addf %32, %33 : vector<8x16xf32>
    %cst_15 = arith.constant 0.000000e+00 : f32
    %35 = vector.broadcast %cst_15 : f32 to vector<8x16xf32>
    %36 = arith.cmpf ogt, %34, %35 : vector<8x16xf32>
    %cst_16 = arith.constant 2.000000e-01 : f32
    %37 = vector.broadcast %cst_16 : f32 to vector<8x16xf32>
    %38 = arith.mulf %37, %34 : vector<8x16xf32>
    %39 = arith.select %36, %34, %38 : vector<8x16xi1>, vector<8x16xf32>
    %40 = arith.addf %39, %1 : vector<8x16xf32>
    %cst_17 = arith.constant dense<0xFF800000> : vector<8xf32>
    %41 = vector.multi_reduction <maximumf>, %40, %cst_17 [1] : vector<8x16xf32> to vector<8xf32>
    %42 = vector.shape_cast %41 : vector<8xf32> to vector<8x1xf32>
    %43 = vector.broadcast %42 : vector<8x1xf32> to vector<8x16xf32>
    %44 = arith.subf %40, %43 : vector<8x16xf32>
    %45 = math.exp %44 : vector<8x16xf32>
    %46 = arith.truncf %45 : vector<8x16xf32> to vector<8x16xbf16>
    %cst_18 = arith.constant dense<0.000000e+00> : vector<8x9xf32>
    %47 = tpu.matmul %46, %31, %cst_18 {dimension_numbers = #tpu.dot_dimension_numbers<[1], [0], [0], [1], [0, 0, 1, 1], [], []>} : vector<8x16xbf16>, vector<16x9xbf16>, vector<8x9xf32> -> vector<8x9xf32>
    %48 = vector.extract_strided_slice %47 {offsets = [0, 0], sizes = [8, 8], strides = [1, 1]} : vector<8x9xf32> to vector<8x8xf32>
    %49 = vector.extract_strided_slice %47 {offsets = [0, 8], sizes = [8, 1], strides = [1, 1]} : vector<8x9xf32> to vector<8x1xf32>
    %50 = tpu.reciprocal %49 {approx = true} : vector<8x1xf32> -> vector<8x1xf32>
    %51 = vector.broadcast %50 : vector<8x1xf32> to vector<8x8xf32>
    %52 = arith.mulf %48, %51 : vector<8x8xf32>
    %53 = vector.extract_strided_slice %2 {offsets = [0, 2], sizes = [8, 1], strides = [1, 1]} : vector<8x4xf32> to vector<8x1xf32>
    %c2 = arith.constant 2 : index
    %c0_19 = arith.constant 0 : index
    %54 = vector.load %arg3[%c2, %c0_19] : memref<4x16xf32, #tpu.memory_space<vmem>>, vector<1x16xf32>
    %c2_20 = arith.constant 2 : index
    %c0_21 = arith.constant 0 : index
    %c0_22 = arith.constant 0 : index
    %55 = vector.load %arg4[%c2_20, %c0_21, %c0_22] : memref<4x16x9xbf16, #tpu.memory_space<vmem>>, vector<1x16x9xbf16>
    %56 = vector.shape_cast %55 : vector<1x16x9xbf16> to vector<16x9xbf16>
    %57 = vector.broadcast %53 : vector<8x1xf32> to vector<8x16xf32>
    %58 = vector.broadcast %54 : vector<1x16xf32> to vector<8x16xf32>
    %59 = arith.addf %57, %58 : vector<8x16xf32>
    %cst_23 = arith.constant 0.000000e+00 : f32
    %60 = vector.broadcast %cst_23 : f32 to vector<8x16xf32>
    %61 = arith.cmpf ogt, %59, %60 : vector<8x16xf32>
    %cst_24 = arith.constant 2.000000e-01 : f32
    %62 = vector.broadcast %cst_24 : f32 to vector<8x16xf32>
    %63 = arith.mulf %62, %59 : vector<8x16xf32>
    %64 = arith.select %61, %59, %63 : vector<8x16xi1>, vector<8x16xf32>
    %65 = arith.addf %64, %1 : vector<8x16xf32>
    %cst_25 = arith.constant dense<0xFF800000> : vector<8xf32>
    %66 = vector.multi_reduction <maximumf>, %65, %cst_25 [1] : vector<8x16xf32> to vector<8xf32>
    %67 = vector.shape_cast %66 : vector<8xf32> to vector<8x1xf32>
    %68 = vector.broadcast %67 : vector<8x1xf32> to vector<8x16xf32>
    %69 = arith.subf %65, %68 : vector<8x16xf32>
    %70 = math.exp %69 : vector<8x16xf32>
    %71 = arith.truncf %70 : vector<8x16xf32> to vector<8x16xbf16>
    %cst_26 = arith.constant dense<0.000000e+00> : vector<8x9xf32>
    %72 = tpu.matmul %71, %56, %cst_26 {dimension_numbers = #tpu.dot_dimension_numbers<[1], [0], [0], [1], [0, 0, 1, 1], [], []>} : vector<8x16xbf16>, vector<16x9xbf16>, vector<8x9xf32> -> vector<8x9xf32>
    %73 = vector.extract_strided_slice %72 {offsets = [0, 0], sizes = [8, 8], strides = [1, 1]} : vector<8x9xf32> to vector<8x8xf32>
    %74 = vector.extract_strided_slice %72 {offsets = [0, 8], sizes = [8, 1], strides = [1, 1]} : vector<8x9xf32> to vector<8x1xf32>
    %75 = tpu.reciprocal %74 {approx = true} : vector<8x1xf32> -> vector<8x1xf32>
    %76 = vector.broadcast %75 : vector<8x1xf32> to vector<8x8xf32>
    %77 = arith.mulf %73, %76 : vector<8x8xf32>
    %78 = vector.extract_strided_slice %2 {offsets = [0, 3], sizes = [8, 1], strides = [1, 1]} : vector<8x4xf32> to vector<8x1xf32>
    %c3 = arith.constant 3 : index
    %c0_27 = arith.constant 0 : index
    %79 = vector.load %arg3[%c3, %c0_27] : memref<4x16xf32, #tpu.memory_space<vmem>>, vector<1x16xf32>
    %c3_28 = arith.constant 3 : index
    %c0_29 = arith.constant 0 : index
    %c0_30 = arith.constant 0 : index
    %80 = vector.load %arg4[%c3_28, %c0_29, %c0_30] : memref<4x16x9xbf16, #tpu.memory_space<vmem>>, vector<1x16x9xbf16>
    %81 = vector.shape_cast %80 : vector<1x16x9xbf16> to vector<16x9xbf16>
    %82 = vector.broadcast %78 : vector<8x1xf32> to vector<8x16xf32>
    %83 = vector.broadcast %79 : vector<1x16xf32> to vector<8x16xf32>
    %84 = arith.addf %82, %83 : vector<8x16xf32>
    %cst_31 = arith.constant 0.000000e+00 : f32
    %85 = vector.broadcast %cst_31 : f32 to vector<8x16xf32>
    %86 = arith.cmpf ogt, %84, %85 : vector<8x16xf32>
    %cst_32 = arith.constant 2.000000e-01 : f32
    %87 = vector.broadcast %cst_32 : f32 to vector<8x16xf32>
    %88 = arith.mulf %87, %84 : vector<8x16xf32>
    %89 = arith.select %86, %84, %88 : vector<8x16xi1>, vector<8x16xf32>
    %90 = arith.addf %89, %1 : vector<8x16xf32>
    %cst_33 = arith.constant dense<0xFF800000> : vector<8xf32>
    %91 = vector.multi_reduction <maximumf>, %90, %cst_33 [1] : vector<8x16xf32> to vector<8xf32>
    %92 = vector.shape_cast %91 : vector<8xf32> to vector<8x1xf32>
    %93 = vector.broadcast %92 : vector<8x1xf32> to vector<8x16xf32>
    %94 = arith.subf %90, %93 : vector<8x16xf32>
    %95 = math.exp %94 : vector<8x16xf32>
    %96 = arith.truncf %95 : vector<8x16xf32> to vector<8x16xbf16>
    %cst_34 = arith.constant dense<0.000000e+00> : vector<8x9xf32>
    %97 = tpu.matmul %96, %81, %cst_34 {dimension_numbers = #tpu.dot_dimension_numbers<[1], [0], [0], [1], [0, 0, 1, 1], [], []>} : vector<8x16xbf16>, vector<16x9xbf16>, vector<8x9xf32> -> vector<8x9xf32>
    %98 = vector.extract_strided_slice %97 {offsets = [0, 0], sizes = [8, 8], strides = [1, 1]} : vector<8x9xf32> to vector<8x8xf32>
    %99 = vector.extract_strided_slice %97 {offsets = [0, 8], sizes = [8, 1], strides = [1, 1]} : vector<8x9xf32> to vector<8x1xf32>
    %100 = tpu.reciprocal %99 {approx = true} : vector<8x1xf32> -> vector<8x1xf32>
    %101 = vector.broadcast %100 : vector<8x1xf32> to vector<8x8xf32>
    %102 = arith.mulf %98, %101 : vector<8x8xf32>
    %103 = tpu.concatenate %27, %52, %77, %102 in 1 : vector<8x8xf32>, vector<8x8xf32>, vector<8x8xf32>, vector<8x8xf32> -> vector<8x32xf32>
    %c0_35 = arith.constant 0 : index
    %c0_36 = arith.constant 0 : index
    %104 = vector.load %arg5[%c0_35, %c0_36] : memref<1x32xf32, #tpu.memory_space<vmem>>, vector<1x32xf32>
    %105 = vector.broadcast %104 : vector<1x32xf32> to vector<8x32xf32>
    %106 = arith.addf %103, %105 : vector<8x32xf32>
    %cst_37 = arith.constant 0.000000e+00 : f32
    %107 = vector.broadcast %cst_37 : f32 to vector<8x32xf32>
    %108 = arith.cmpf ogt, %106, %107 : vector<8x32xf32>
    %109 = math.exp %106 : vector<8x32xf32>
    %cst_38 = arith.constant 1.000000e+00 : f32
    %110 = vector.broadcast %cst_38 : f32 to vector<8x32xf32>
    %111 = arith.subf %109, %110 : vector<8x32xf32>
    %112 = arith.select %108, %106, %111 : vector<8x32xi1>, vector<8x32xf32>
    %cst_39 = arith.constant 0.000000e+00 : f32
    %113 = vector.broadcast %cst_39 : f32 to vector<8x96xf32>
    %114 = tpu.concatenate %112, %113 in 1 : vector<8x32xf32>, vector<8x96xf32> -> vector<8x128xf32>
    %c0_40 = arith.constant 0 : index
    %c0_41 = arith.constant 0 : index
    %115 = vector.load %arg6[%c0_40, %c0_41] : memref<8x128xf32, #tpu.memory_space<vmem>>, vector<8x128xf32>
    tpu.vector_store %arg6[%c0_40, %c0_41], %114 {strides = array<i32>} : memref<8x128xf32, #tpu.memory_space<vmem>>, vector<8x128xf32>,
    return
  }
  func.func @transform_0(%arg0: i32) -> (i32, i32) {
    %c0_i32 = arith.constant 0 : i32
    %c0_i32_0 = arith.constant 0 : i32
    return %arg0, %c0_i32 : i32, i32
  }
  func.func @transform_1(%arg0: i32) -> (i32, i32) {
    %c0_i32 = arith.constant 0 : i32
    %c0_i32_0 = arith.constant 0 : i32
    return %arg0, %c0_i32 : i32, i32
  }
  func.func @transform_2(%arg0: i32) -> (i32, i32) {
    %c0_i32 = arith.constant 0 : i32
    %c0_i32_0 = arith.constant 0 : i32
    %c0_i32_1 = arith.constant 0 : i32
    return %c0_i32, %c0_i32_0 : i32, i32
  }
  func.func @transform_3(%arg0: i32) -> (i32, i32, i32) {
    %c0_i32 = arith.constant 0 : i32
    %c0_i32_0 = arith.constant 0 : i32
    %c0_i32_1 = arith.constant 0 : i32
    %c0_i32_2 = arith.constant 0 : i32
    return %c0_i32, %c0_i32_0, %c0_i32_1 : i32, i32, i32
  }
  func.func @transform_4(%arg0: i32) -> (i32, i32) {
    %c0_i32 = arith.constant 0 : i32
    %c0_i32_0 = arith.constant 0 : i32
    %c0_i32_1 = arith.constant 0 : i32
    return %c0_i32, %c0_i32_0 : i32, i32
  }
  func.func @transform_5(%arg0: i32) -> (i32, i32) {
    %c0_i32 = arith.constant 0 : i32
    %c0_i32_0 = arith.constant 0 : i32
    return %arg0, %c0_i32 : i32, i32
  }
}

</mosaic_0001>

<bundles_post_ra>
// kernel: tpu_custom_call.1
= control target key start
LH: loop header
LB: loop body
LE: loop exit
PB: predicated region body
PF: predicated region fallthrough
CT: control target
= control target key end

     0   :  { %10 = vsyncpa [#allocation3], 0  ;;  %s903_s0 = inlined_call_operand.vmem [shape: bf16[16,16], index: 0, kind: input, shape index: {}]   ;;  %s904_s1 = inlined_call_operand.vmem [shape: f32[16,4], index: 1, kind: input, shape index: {}]   ;;  %s905_s2 = inlined_call_operand.vmem [shape: f32[4,16], index: 2, kind: input, shape index: {}]   ;;  %s906_s3 = inlined_call_operand.vmem [shape: bf16[4,16,9], index: 3, kind: input, shape index: {}]   ;;  %s907_s4 = inlined_call_operand.vmem [shape: f32[1,32], index: 4, kind: input, shape index: {}]   ;;  %s908_s5 = inlined_call_operand.hbm [shape: f32[16,128], index: 5, kind: output, shape index: {}]  }
   0x1   :  { %12 = vsyncpa [#allocation3 + $0x1], 0  ;;  %s779_s18 = smov 0   ;;  %s781_s19 = smov 0  }
   0x2   :  { %s783_s20 = smov 0   ;;  %s785_s21 = smov 0  }
   0x3 LB: > { %s800_s22 = sadd.s32 4294967295, %s739_s21   ;;  %s559_s23 = sadd.s32 4294967294, %s739_s21   ;;  %s739_s21 = sphi %s785_s21, %s914_s21   ;;  %s735_s20 = sphi %s783_s20, %s913_s20   ;;  %s731_s19 = sphi %s781_s19, %s912_s19   ;;  %s727_s18 = sphi %s779_s18, %s911_s18  }
   0x4   : > { %s804_s24 = sadd.s32 1, %s739_s21   ;;  %s140_s25 = sadd.s32 1, %s735_s20 }
   0x5   : > { %s137_s26 = ssub.s32 %s739_s21, %s804_s24  ;;  %p150_p0 = scmp.ne.s32.totalorder %s735_s20, %s731_s19 }
   0x6   : > { %p138_p1 = scmp.eq.s32.totalorder %s137_s26, 0  ;;  %p151_p2 = scmp.eq.s32.totalorder %s800_s22, 1 }
   0x7   : > { %p156_p3 = scmp.ne.s32.totalorder %s731_s19, %s727_s18  ;;  %p157_p4 = scmp.eq.s32.totalorder %s559_s23, 1 }
   0x8   : > { %s815_s27 = scalar_select %p138_p1, %s735_s20, %s140_s25  }
   0x9   : > { %p817_p5 = por %p151_p2, %p150_p0  ;;  %p821_p6 = por %p157_p4, %p156_p3 }
   0xa   : > { %p562_p7 = scmp.ge.s32.totalorder %s739_s21, 1  ;;  %p198_p8 = scmp.lt.s32.totalorder %s739_s21, 3 }
   0xc   : > { %p199_p9 = pnand %p562_p7, %p198_p8 }
   0xd   : > { %p229_p10 = scmp.lt.s32.totalorder (!%p199_p9), %s800_s22, 1  ;;  %s746_s14 = smov (!%p199_p9), 16  }
   0xe   : > { %202 = sbr.rel (%p199_p9) target bundleno = 651 (0x28b), region = 40  ;;  %s747_s15 = smov (!%p199_p9), 8  }
   0xf   : > { %s748_s16 = smov (!%p199_p9), 24   ;;  %s226_s25 = sand.u32 (!%p199_p9), 1, %s731_s19  }
  0x10   : > { %s563_s26 = sshll.u32 (!%p199_p9), %s226_s25, 3  ;;  %s473_s12 = scalar_lea.sflag (!%p199_p9), [#allocation3], %s226_s25 }
  0x13   : > { %v741_v0 = vmov 2   ;;  %v742_v1 = vmov 1   ;;  %s230_s30 = scalar_select %p229_p10, %s800_s22, 1  ;;  %v743_v3 = vmov 3   ;;  %v744_v4 = vmov 0   ;;  %v598_v35 = vld [vmem:[%s906_s3 + $0x8] sm:$0xff] }
  0x14   : > { %648 = vset.pattern.permute.xlu0 %v741_v0  ;;  %650 = vset.pattern.permute.xlu1 %v742_v1  ;;  %v654_v5 = vld [vmem:[%s905_s2 + $0x1] ss:$0 sm:$0xff]  ;;  %v655_v6 = vld [vmem:[%s905_s2 + $0x2] ss:$0 sm:$0xff]  ;;  %vm255_vm2 = vcmask 130048   ;;  %v599_v36 = vld [vmem:[%s906_s3 + $0x10] sm:$0xff] }
  0x15   : > { %s565_s6 = sshll.u32 %s230_s30, 3  ;;  %s564_s10 = sshll.u32 %s230_s30, 2  ;;  %v656_v17 = vld [vmem:[%s905_s2 + $0x3] ss:$0 sm:$0xff]  ;;  %v657_v20 = vld [vmem:[%s905_s2] ss:$0 sm:$0xff]  ;;  %329 = vmatpush.bf16.msra.mxu1 %v598_v35  ;;  %379 = vmatpush.bf16.msra.mxu2 %v599_v36 }
  0x16   : > { %s236_s9 = scalar_lea.vmem %s904_s1, %s565_s6  ;;  %s232_s13 = scalar_lea.vmem %s903_s0, %s564_s10  ;;  %v600_v37 = vld [vmem:[%s906_s3 + $0x18] sm:$0xff]  ;;  %v597_v38 = vld [vmem:[%s906_s3] sm:$0xff]  ;;  %v745_v59 = vmov 8   ;;  %vm454_vm5 = vcmask 64512   ;;  %vm457_vm6 = vcmask 195584   ;;  %vm469_vm7 = vcmask 261120  }
  0x17   : > { %v240_v2 = vld [vmem:[%s236_s9] sm:$0xff]  ;;  %429 = vmatpush.bf16.msra.mxu3 %v600_v37  ;;  %279 = vmatpush.bf16.msra.mxu0 %v597_v38  ;;  %s594_s30 = sshll.u32 %s800_s22, 3  ;;  %s228_s9 = scalar_lea.vmem [#allocation2], %s563_s26 }
  0x18   : > { %297 = vperm.xlu1 %650, %v240_v2   ;;  %347 = vperm.xlu0 %648, %v240_v2   ;;  %v238_v7 = vld [vmem:[%s232_s13] sm:$0xf]  ;;  %s483_s8 = scalar_lea.hbm %s908_s5, %s594_s30  ;;  %s485_s10 = sshll.u32 %s228_s9, 4  ;;  %s486_s10 = int_to_ptr.vmem [resolvable:$true] %s485_s10 }
  0x19   : > { %v239_v12 = vunpack.c.l.bf16 %v238_v7  ;;  %653 = vset.pattern.permute.xlu2 %v745_v59  ;;  %s487_s11 = sshll.u32 %s483_s8, 4  ;;  %s488_s11 = int_to_ptr.hbm [resolvable:$true] %s487_s11 }
  0x1a   : > { %s691_s13 = sshra.s32 %s488_s11, 4  ;;  %s692_s13 = int_to_ptr.hbm [resolvable:$true] %s691_s13 }
  0x1b   : > { %s693_s22 = scalar_lea.hbm %s692_s13, 8  ;;  %p698_p0 = scmp.lt.s32.totalorder %s692_s13, %s908_s5 }
  0x1c   : > { %p694_p11 = scmp.ne.s32.totalorder %s692_s13, %s693_s22 }
  0x1e   : > { %p695_p12 = pnand %p694_p11, %p817_p5 }
  0x20   : > { %649 = vset.pattern.permute.xlu0 %v743_v3  ;;  %651 = vset.pattern.permute.xlu1 %v744_v4  ;;  %p696_p13 = pneg %p695_p12 }
  0x21   : > { %397 = vperm.xlu0 %649, %v240_v2   ;;  %246 = vperm.xlu1 %651, %v240_v2  }
  0x29   : > { %652 = vset.pattern.permute.xlu0 %v745_v59 }
  0x8a   : > { %v298_v8 = vpop.permute.xlu1 %297  ;;  %v348_v9 = vpop.permute.xlu0 %347 }
  0x8b   : > { %v301_v10 = vadd.f32 %v654_v5, %v298_v8  ;;  %v351_v11 = vadd.f32 %v655_v6, %v348_v9 }
  0x8d   : > { %vm302_vm0 = vcmp.gt.f32.partialorder %v301_v10, 0.0  ;;  %v303_v13 = vmul.f32 0.2, %v301_v10  ;;  %v353_v14 = vmul.f32 0.2, %v351_v11  ;;  %vm352_vm1 = vcmp.gt.f32.partialorder %v351_v11, 0.0 }
  0x8f   : > { %v354_v15 = vsel %vm352_vm1, %v351_v11, %v353_v14  ;;  %v304_v16 = vsel %vm302_vm0, %v301_v10, %v303_v13 }
  0x90   : > { %v355_v18 = vadd.f32 %v354_v15, %v239_v12  ;;  %v305_v19 = vadd.f32 %v304_v16, %v239_v12 }
  0x92   : > { %v356_v21 = vsel %vm255_vm2, %v355_v18, -inf  ;;  %v306_v22 = vsel %vm255_vm2, %v305_v19, -inf }
  0x93   : > { %v398_v23 = vpop.permute.xlu0 %397  ;;  %357 = vmax.xlane.f32.xlu2 %v356_v21  ;;  %307 = vmax.xlane.f32.xlu1 %v306_v22  ;;  %v247_v24 = vpop.permute.xlu1 %246 }
  0x94   : > { %v401_v25 = vadd.f32 %v656_v17, %v398_v23  ;;  %v250_v26 = vadd.f32 %v657_v20, %v247_v24 }
  0x96   : > { %vm402_vm3 = vcmp.gt.f32.partialorder %v401_v25, 0.0  ;;  %v403_v27 = vmul.f32 0.2, %v401_v25  ;;  %v252_v28 = vmul.f32 0.2, %v250_v26  ;;  %vm251_vm4 = vcmp.gt.f32.partialorder %v250_v26, 0.0 }
  0x98   : > { %v404_v29 = vsel %vm402_vm3, %v401_v25, %v403_v27  ;;  %v253_v31 = vsel %vm251_vm4, %v250_v26, %v252_v28 }
  0x99   : > { %v405_v30 = vadd.f32 %v404_v29, %v239_v12  ;;  %v254_v33 = vadd.f32 %v253_v31, %v239_v12 }
  0x9b   : > { %v406_v32 = vsel %vm255_vm2, %v405_v30, -inf  ;;  %v256_v34 = vsel %vm255_vm2, %v254_v33, -inf }
  0x9c   : > { %407 = vmax.xlane.f32.xlu2 %v406_v32 }
  0xa4   : > { %257 = vmax.xlane.f32.xlu2 %v256_v34 }
 0x106   : > { %v358_v39 = vpop.xlane.xlu2 %357  ;;  %v308_v40 = vpop.xlane.xlu1 %307 }
 0x107   : > { %v359_v41 = vsub.f32 %v355_v18, %v358_v39  ;;  %v309_v42 = vsub.f32 %v305_v19, %v308_v40  ;;  %v658_v18 = vld [vmem:[%s907_s4] ss:$0 sm:$0xff] }
 0x109   : > { %v360_v43 = vmul.f32 1.442695, %v359_v41  ;;  %v310_v44 = vmul.f32 1.442695, %v309_v42 }
 0x10b   : > { %659 = vpow2.f32 %v360_v43 }
 0x10c   : > { %661 = vpow2.f32 %v310_v44 }
 0x10f   : > { %v408_v45 = vpop.xlane.xlu2 %407 }
 0x110   : > { %v409_v46 = vsub.f32 %v405_v30, %v408_v45 }
 0x111   : > { %v660_v47 = vpop.eup %659 }
 0x112   : > { %v662_v48 = vpop.eup %661  ;;  %v362_v49 = vpack.c.bf16 %v660_v47, %v660_v47  ;;  %v410_v50 = vmul.f32 1.442695, %v409_v46 }
 0x113   : > { %v312_v51 = vpack.c.bf16 %v662_v48, %v662_v48 }
 0x114   : > { %663 = vpow2.f32 %v410_v50  ;;  %584 = vmatmul.msk.bf16.vlgmr.msra.gmra.mxu2 %vm255_vm2, %v362_v49 }
 0x115   : > { %577 = vmatmul.msk.bf16.vlgmr.msra.gmra.mxu1 %vm255_vm2, %v312_v51 }
 0x117   : > { %v258_v52 = vpop.xlane.xlu2 %257 }
 0x118   : > { %v259_v53 = vsub.f32 %v254_v33, %v258_v52 }
 0x11a   : > { %v664_v54 = vpop.eup %663  ;;  %v260_v55 = vmul.f32 1.442695, %v259_v53 }
 0x11b   : > { %v412_v56 = vpack.c.bf16 %v664_v54, %v664_v54 }
 0x11c   : > { %665 = vpow2.f32 %v260_v55 }
 0x11d   : > { %591 = vmatmul.msk.bf16.vlgmr.msra.gmra.mxu3 %vm255_vm2, %v412_v56 }
 0x122   : > { %v666_v57 = vpop.eup %665 }
 0x123   : > { %v262_v58 = vpack.c.bf16 %v666_v57, %v666_v57 }
 0x125   : > { %570 = vmatmul.msk.bf16.vlgmr.msra.gmra.mxu0 %vm255_vm2, %v262_v58 }
 0x192   : > { %v331_v60 = vpop.f32.mrf.mxu1 }
 0x193   : > { %667 = vrcp.f32 %v331_v60 }
 0x197   : > { %v381_v61 = vpop.f32.mrf.mxu2 }
 0x198   : > { %669 = vrcp.f32 %v381_v61 }
 0x199   : > { %v668_v62 = vpop.eup %667 }
 0x19a   : > { %338 = vperm.xlu0 %652, %v668_v62   ;;  %v333_v63 = vpop.f32.mrf.mxu1 }
 0x19e   : > { %v670_v0 = vpop.eup %669 }
 0x19f   : > { %v383_v1 = vpop.f32.mrf.mxu2  ;;  %388 = vperm.xlu2 %653, %v670_v0  }
 0x1a0   : > { %v431_v2 = vpop.f32.mrf.mxu3 }
 0x1a1   : > { %671 = vrcp.f32 %v431_v2 }
 0x1a2   : > { %v281_v3 = vpop.f32.mrf.mxu0 }
 0x1a3   : > { %673 = vrcp.f32 %v281_v3 }
 0x1a7   : > { %v672_v4 = vpop.eup %671 }
 0x1a8   : > { %v433_v5 = vpop.f32.mrf.mxu3  ;;  %438 = vperm.xlu0 %652, %v672_v4  }
 0x1a9   : > { %v674_v7 = vpop.eup %673 }
 0x1aa   : > { %v283_v6 = vpop.f32.mrf.mxu0 }
 0x1b0   : > { %288 = vperm.xlu0 %652, %v674_v7  }
 0x1f9   : > { %v389_v8 = vpop.permute.xlu2 %388 }
 0x1fa   : > { %v391_v9 = vmul.f32 %v389_v8, %v381_v61 }
 0x1fc   : > { %447 = vrot.lane.b32.xlu0 %v391_v9, %s746_s14 }
 0x20c   : > { %v339_v10 = vpop.permute.xlu0 %338 }
 0x20d   : > { %v341_v11 = vmul.f32 %v339_v10, %v331_v60 }
 0x20f   : > { %443 = vrot.lane.b32.xlu2 %v341_v11, %s747_s15 }
 0x21a   : > { %v439_v12 = vpop.permute.xlu0 %438 }
 0x21b   : > { %v441_v13 = vmul.f32 %v439_v12, %v431_v2 }
 0x21d   : > { %451 = vrot.lane.b32.xlu2 %v441_v13, %s748_s16  ;;  %s697_s16 = scalar_lea.hbm %s908_s5, 16 }
 0x21e   : > { %p699_p1 = scmp.lt.s32.totalorder %s697_s16, %s693_s22 }
 0x220   : > { %p700_p2 = por %p699_p1, %p698_p0 }
 0x222   : > { %v289_v14 = vpop.permute.xlu0 %288  ;;  %p701_p3 = pnand %p700_p2, %p696_p13 }
 0x223   : > { %v291_v16 = vmul.f32 %v289_v14, %v281_v3 }
 0x269   : > { %v444_v15 = vpop.permute.xlu2 %443 }
 0x26a   : > { %v455_v19 = vsel %vm454_vm5, %v291_v16, %v444_v15 }
 0x26e   : > { %v448_v17 = vpop.permute.xlu0 %447 }
 0x26f   : > { %v456_v20 = vsel %vm255_vm2, %v455_v19, %v448_v17 }
 0x277   : > { %v452_v21 = vpop.permute.xlu2 %451 }
 0x278   : > { %v458_v22 = vsel %vm457_vm6, %v456_v20, %v452_v21 }
 0x279   : > { %v463_v23 = vadd.f32 %v658_v18, %v458_v22 }
 0x27b   : > { %v465_v24 = vmul.f32 1.442695, %v463_v23  ;;  %vm464_vm8 = vcmp.gt.f32.partialorder %v463_v23, 0.0 }
 0x27d   : > { %675 = vpow2.f32 %v465_v24 }
 0x283   : > { %v676_v25 = vpop.eup %675 }
 0x284   : > { %v592_v26 = vadd.f32 -1.0, %v676_v25 }
 0x286   : > { %v468_v27 = vsel %vm464_vm8, %v463_v23, %v592_v26 }
 0x287   : > { %v470_v28 = vsel %vm469_vm7, %v468_v27, 0.0 }
 0x288   : > { %471 = vst [vmem:[%s228_s9] sm:$0xff] %v470_v28 }
 0x289   : > { %704 = shalt.err (!%p701_p3)
}
 0x28a   : > { %601 = dma.vmem_to_hbm [thread:$0]  (%p817_p5), %s486_s10, 128, %s488_s11, %s473_s12  }
 0x28b PF: > { %p607_p4 = scmp.ge.s32.totalorder %s739_s21, 2  ;;  %s499_s25 = sand.u32 1, %s727_s18  }
 0x28c   : > { %s500_s26 = scalar_lea.sflag [#allocation3], %s499_s25 }
 0x28d   : > { %p604_p7 = pnand %p607_p4, %p821_p6 }
 0x28f   : > { %p605_p8 = pneg %p604_p7 }
 0x291   : > { %722 = dma.done.wait (%p605_p8), %s500_s26, 128  }
 0x292   : > { %724 = vsyncadd (%p605_p8), %s500_s26, 4294967168  ;;  %p15_p9 = scmp.ge.s32.totalorder %s804_s24, 4   ;;  %s911_s18 = smov %s731_s19 }
 0x293   : > { %s912_s19 = smov %s735_s20  ;;  %s913_s20 = smov %s815_s27 }
 0x294   : > { %s914_s21 = smov %s804_s24  ;;  %17 = sbr.rel (!%p15_p9) target bundleno = 3 (0x3), region = 81 }
 0x299   :  { %506 = vsyncpa [#allocation3], 1 }
 0x29a   :  { %508 = vsyncpa [#allocation3 + $0x1], 1 }

</bundles_post_ra>
